<compile_context>
chip_gen: v5e
topology: v5e:2x2
jax: 0.10.0
libtpu: 0.0.40
codegen_flags: <defaults>
</compile_context>

<pallas_src>
import numpy as np
import jax
import jax.numpy as jnp
from jax.experimental import pallas as pl
from jax.experimental.pallas import tpu as pltpu

C_BINS = 11                      # c
N_OBJ = 2                        # nO
FEAT = 20                        # common / critic hidden width
N_OUT = C_BINS ** N_OBJ          # 121 real logits
N_OUT_PAD = 128                  # lane-dense padded logit width


# ---------------- fused Pallas kernel (one grid step == one example) ----------------

def critic_fused_kernel(p_ref, wconv_ref, bconv_ref, wfc_ref, bfc_ref,
                        w1_ref, b1_ref, w2_ref, b2_ref, o_ref):
    """conv(im2col matmul)+ReLU -> Linear(1024,20)+Tanh -> critic MLP -> softmax,
    all kept in VMEM/vregs (no HBM intermediates)."""
    # conv as matmul: [F, C*k*k] @ [C*k*k, OH*OW] -> [F, OH*OW], + bias, ReLU
    patches = p_ref[0]                                              # [36, 64]
    conv = jnp.dot(wconv_ref[...], patches,
                   preferred_element_type=jnp.float32)
    conv = jnp.maximum(conv + bconv_ref[...], 0.0)                  # [16, 64]

    # Flatten-free Linear(F*OH*OW, 20): h[j] = sum_f sum_o conv[f,o] * Wfc[f,o,j]
    # (w_fc pre-reshaped host-side to [F, OH*OW, 20] in PyTorch (f,oh,ow) order,
    #  so no in-kernel flatten / transpose / layout change is needed.)
    h = bfc_ref[...]                                                # [1, 20]
    for f in range(conv.shape[0]):                                  # static unroll (16)
        h = h + jnp.dot(conv[f:f + 1, :], wfc_ref[f],
                        preferred_element_type=jnp.float32)
    h = jnp.tanh(h)

    # critic: Linear(20,20) -> Tanh -> Linear(20, 128 padded)
    h = jnp.tanh(jnp.dot(h, w1_ref[...],
                         preferred_element_type=jnp.float32) + b1_ref[...])
    logits = jnp.dot(h, w2_ref[...],
                     preferred_element_type=jnp.float32) + b2_ref[...]   # [1, 128]

    # softmax over dim=1; padded columns carry bias = -1e30 -> prob exactly 0
    m = jnp.max(logits, axis=-1, keepdims=True)
    e = jnp.exp(logits - m)
    inv = pl.reciprocal(jnp.sum(e, axis=-1, keepdims=True), approx=True)
    o_ref[0] = e * inv


# ---------------- wrapper ----------------

def critic_forward(state, params):
    """state: [B, C, H, W] float32 (NCHW) -> [B, c, c] softmax probabilities."""
    B, C, H, W = state.shape
    k, stride, pad = 3, 2, 1
    OH, OW = H // stride, W // stride

    # host-side im2col. Natural output layout is [B, C*k*k, OH, OW] with the
    # patch channel ordered (c, kh, kw) == PyTorch Conv2d weight flatten order,
    # so only a trailing-dim reshape (no transpose) is needed.
    # TODO(synk): pulling this gather fully inside the kernel (per-example DMA +
    # strided pl.ds slicing) would remove the last piece of XLA glue.
    patches = jax.lax.conv_general_dilated_patches(
        state, (k, k), (stride, stride), ((pad, pad), (pad, pad))
    ).reshape(B, C * k * k, OH * OW)

    probs = pl.pallas_call(
        critic_fused_kernel,
        out_shape=jax.ShapeDtypeStruct((B, 1, N_OUT_PAD), jnp.float32),
        grid=(B,),
        in_specs=[
            pl.BlockSpec((1, C * k * k, OH * OW), lambda b: (b, 0, 0)),
            pl.BlockSpec(params["w_conv"].shape, lambda b: (0, 0)),
            pl.BlockSpec(params["b_conv"].shape, lambda b: (0, 0)),
            pl.BlockSpec(params["w_fc3"].shape, lambda b: (0, 0, 0)),
            pl.BlockSpec(params["b_fc"].shape, lambda b: (0, 0)),
            pl.BlockSpec(params["w1"].shape, lambda b: (0, 0)),
            pl.BlockSpec(params["b1"].shape, lambda b: (0, 0)),
            pl.BlockSpec(params["w2"].shape, lambda b: (0, 0)),
            pl.BlockSpec(params["b2"].shape, lambda b: (0, 0)),
        ],
        out_specs=pl.BlockSpec((1, 1, N_OUT_PAD), lambda b: (b, 0, 0)),
        compiler_params=pltpu.CompilerParams(
            dimension_semantics=("parallel",)),
    )(patches, params["w_conv"], params["b_conv"], params["w_fc3"],
      params["b_fc"], params["w1"], params["b1"], params["w2"], params["b2"])

    # drop padding lanes, then x.view(-1, c, c)
    return probs[:, 0, :N_OUT].reshape(-1, C_BINS, C_BINS)


# ---------------- pure-JAX reference (correctness check, no Pallas) ----------------

def critic_reference(state, params):
    B, C, H, W = state.shape
    F_conv = params["w_conv"].shape[0]
    w = params["w_conv"].reshape(F_conv, C, 3, 3)                   # OIHW
    conv = jax.lax.conv_general_dilated(
        state, w, (2, 2), ((1, 1), (1, 1)),
        dimension_numbers=("NCHW", "OIHW", "NCHW"))
    conv = jnp.maximum(conv + params["b_conv"].reshape(1, F_conv, 1, 1), 0.0)
    feat = conv.reshape(B, -1)                                      # (f, oh, ow) flatten
    h = jnp.tanh(feat @ params["w_fc3"].reshape(-1, FEAT) + params["b_fc"])
    h = jnp.tanh(h @ params["w1"] + params["b1"])
    logits = h @ params["w2"][:, :N_OUT] + params["b2"][:, :N_OUT]
    return jax.nn.softmax(logits, axis=1).reshape(-1, C_BINS, C_BINS)


# ---------------- deterministic init (nn.init.orthogonal_, gain=sqrt(2)) ----------------

def orthogonal_np(rng, shape, gain):
    rows = shape[0]
    cols = int(np.prod(shape[1:]))
    a = rng.standard_normal((max(rows, cols), min(rows, cols)))
    q, r = np.linalg.qr(a)
    q = q * np.sign(np.diag(r))
    if rows < cols:
        q = q.T
    return jnp.asarray(gain * q[:rows, :cols].reshape(shape), dtype=jnp.float32)


if __name__ == "__main__":
    B, C, H, W = 2, 4, 16, 16
    F_conv = 16
    OH, OW = H // 2, W // 2
    gain = float(np.sqrt(2.0))
    rng = np.random.default_rng(0)

    # TODO(synk): actor.common is defined outside this module (passed via `actor`);
    # we use a representative Conv2d(C,16,3,s=2,p=1)->ReLU->Flatten->Linear(.,20)->Tanh
    # feature extractor producing the 20-dim features the critic head requires.
    w_fc_pt = orthogonal_np(rng, (FEAT, F_conv * OH * OW), gain)     # [20, 1024]
    w2_pt = orthogonal_np(rng, (N_OUT, FEAT), gain)                  # [121, 20]
    params = {
        # conv weight in PyTorch [F, C*k*k] layout (kernel computes W @ patches)
        "w_conv": orthogonal_np(rng, (F_conv, C * 3 * 3), gain),     # [16, 36]
        "b_conv": jnp.zeros((F_conv, 1), jnp.float32),
        # fc weight [in,out] reshaped to [F, OH*OW, 20] ((f,oh,ow) flatten order)
        "w_fc3":  w_fc_pt.T.reshape(F_conv, OH * OW, FEAT),          # [16, 64, 20]
        "b_fc":   jnp.zeros((1, FEAT), jnp.float32),
        # critic = Linear(20,20) -> Tanh -> Linear(20, 121), ortho gain sqrt(2)
        "w1":     orthogonal_np(rng, (FEAT, FEAT), gain).T,          # [20, 20]
        "b1":     jnp.zeros((1, FEAT), jnp.float32),
        # logits padded 121 -> 128: zero weights, -1e30 bias -> softmax prob 0
        "w2":     jnp.concatenate(
            [w2_pt.T, jnp.zeros((FEAT, N_OUT_PAD - N_OUT), jnp.float32)], axis=1),
        "b2":     jnp.concatenate(
            [jnp.zeros((1, N_OUT), jnp.float32),
             jnp.full((1, N_OUT_PAD - N_OUT), -1e30, jnp.float32)], axis=1),
    }

    key = jax.random.PRNGKey(0)
    state = jax.random.normal(key, (B, C, H, W), dtype=jnp.float32)

    out = jax.jit(lambda s: critic_forward(s, params))(state)
    out = jax.block_until_ready(out)

    assert out.shape == (B, C_BINS, C_BINS), out.shape
    row_sums = np.asarray(out.reshape(B, -1).sum(axis=1))
    assert np.allclose(row_sums, 1.0, atol=2e-3), row_sums   # approx-recip tolerance

    ref = np.asarray(critic_reference(state, params))
    max_err = float(np.max(np.abs(np.asarray(out) - ref)))
    assert max_err < 2e-2, max_err                            # MXU default-precision slack

    print("KERNEL_OK")
</pallas_src>

<mosaic_0001>
module attributes {stable_mosaic.version = 11 : i64} {
  func.func @critic_fused_kernel(%arg0: i32, %arg1: memref<1x36x64xf32, #tpu.memory_space<vmem>>, %arg2: memref<16x36xf32, #tpu.memory_space<vmem>>, %arg3: memref<16x1xf32, #tpu.memory_space<vmem>>, %arg4: memref<16x64x20xf32, #tpu.memory_space<vmem>>, %arg5: memref<1x20xf32, #tpu.memory_space<vmem>>, %arg6: memref<20x20xf32, #tpu.memory_space<vmem>>, %arg7: memref<1x20xf32, #tpu.memory_space<vmem>>, %arg8: memref<20x128xf32, #tpu.memory_space<vmem>>, %arg9: memref<1x128xf32, #tpu.memory_space<vmem>>, %arg10: memref<1x1x128xf32, #tpu.memory_space<vmem>>) attributes {dimension_semantics = [#tpu.dimension_semantics<parallel>], iteration_bounds = array<i64: 2>, scalar_prefetch = 0 : i64, scratch_operands = 0 : i64, tpu.core_type = #tpu.core_type<tc>, window_params = [{transform_indices = @transform_0, window_bounds = array<i64: 1, 36, 64>}, {pipeline_mode = #tpu.pipeline_mode<synchronous>, transform_indices = @transform_1, window_bounds = array<i64: 16, 36>}, {pipeline_mode = #tpu.pipeline_mode<synchronous>, transform_indices = @transform_2, window_bounds = array<i64: 16, 1>}, {pipeline_mode = #tpu.pipeline_mode<synchronous>, transform_indices = @transform_3, window_bounds = array<i64: 16, 64, 20>}, {pipeline_mode = #tpu.pipeline_mode<synchronous>, transform_indices = @transform_4, window_bounds = array<i64: 1, 20>}, {pipeline_mode = #tpu.pipeline_mode<synchronous>, transform_indices = @transform_5, window_bounds = array<i64: 20, 20>}, {pipeline_mode = #tpu.pipeline_mode<synchronous>, transform_indices = @transform_6, window_bounds = array<i64: 1, 20>}, {pipeline_mode = #tpu.pipeline_mode<synchronous>, transform_indices = @transform_7, window_bounds = array<i64: 20, 128>}, {pipeline_mode = #tpu.pipeline_mode<synchronous>, transform_indices = @transform_8, window_bounds = array<i64: 1, 128>}, {transform_indices = @transform_9, window_bounds = array<i64: 1, 1, 128>}]} {
    %c0 = arith.constant 0 : index
    %c0_0 = arith.constant 0 : index
    %c0_1 = arith.constant 0 : index
    %0 = vector.load %arg1[%c0, %c0_0, %c0_1] : memref<1x36x64xf32, #tpu.memory_space<vmem>>, vector<1x36x64xf32>
    %1 = vector.shape_cast %0 : vector<1x36x64xf32> to vector<36x64xf32>
    %c0_2 = arith.constant 0 : index
    %c0_3 = arith.constant 0 : index
    %2 = vector.load %arg2[%c0_2, %c0_3] : memref<16x36xf32, #tpu.memory_space<vmem>>, vector<16x36xf32>
    %cst = arith.constant dense<0.000000e+00> : vector<16x64xf32>
    %3 = tpu.matmul %2, %1, %cst {dimension_numbers = #tpu.dot_dimension_numbers<[1], [0], [0], [1], [0, 0, 1, 1], [], []>} : vector<16x36xf32>, vector<36x64xf32>, vector<16x64xf32> -> vector<16x64xf32>
    %c0_4 = arith.constant 0 : index
    %c0_5 = arith.constant 0 : index
    %4 = vector.load %arg3[%c0_4, %c0_5] : memref<16x1xf32, #tpu.memory_space<vmem>>, vector<16x1xf32>
    %5 = vector.broadcast %4 : vector<16x1xf32> to vector<16x64xf32>
    %6 = arith.addf %3, %5 : vector<16x64xf32>
    %cst_6 = arith.constant 0.000000e+00 : f32
    %7 = vector.broadcast %cst_6 : f32 to vector<16x64xf32>
    %8 = arith.maximumf %6, %7 : vector<16x64xf32>
    %c0_7 = arith.constant 0 : index
    %c0_8 = arith.constant 0 : index
    %9 = vector.load %arg5[%c0_7, %c0_8] : memref<1x20xf32, #tpu.memory_space<vmem>>, vector<1x20xf32>
    %10 = vector.extract_strided_slice %8 {offsets = [0, 0], sizes = [1, 64], strides = [1, 1]} : vector<16x64xf32> to vector<1x64xf32>
    %c0_9 = arith.constant 0 : index
    %c0_10 = arith.constant 0 : index
    %c0_11 = arith.constant 0 : index
    %11 = vector.load %arg4[%c0_9, %c0_10, %c0_11] : memref<16x64x20xf32, #tpu.memory_space<vmem>>, vector<1x64x20xf32>
    %12 = vector.shape_cast %11 : vector<1x64x20xf32> to vector<64x20xf32>
    %cst_12 = arith.constant dense<0.000000e+00> : vector<1x20xf32>
    %13 = tpu.matmul %10, %12, %cst_12 {dimension_numbers = #tpu.dot_dimension_numbers<[1], [0], [0], [1], [0, 0, 1, 1], [], []>} : vector<1x64xf32>, vector<64x20xf32>, vector<1x20xf32> -> vector<1x20xf32>
    %14 = arith.addf %9, %13 : vector<1x20xf32>
    %15 = vector.extract_strided_slice %8 {offsets = [1, 0], sizes = [1, 64], strides = [1, 1]} : vector<16x64xf32> to vector<1x64xf32>
    %c1 = arith.constant 1 : index
    %c0_13 = arith.constant 0 : index
    %c0_14 = arith.constant 0 : index
    %16 = vector.load %arg4[%c1, %c0_13, %c0_14] : memref<16x64x20xf32, #tpu.memory_space<vmem>>, vector<1x64x20xf32>
    %17 = vector.shape_cast %16 : vector<1x64x20xf32> to vector<64x20xf32>
    %cst_15 = arith.constant dense<0.000000e+00> : vector<1x20xf32>
    %18 = tpu.matmul %15, %17, %cst_15 {dimension_numbers = #tpu.dot_dimension_numbers<[1], [0], [0], [1], [0, 0, 1, 1], [], []>} : vector<1x64xf32>, vector<64x20xf32>, vector<1x20xf32> -> vector<1x20xf32>
    %19 = arith.addf %14, %18 : vector<1x20xf32>
    %20 = vector.extract_strided_slice %8 {offsets = [2, 0], sizes = [1, 64], strides = [1, 1]} : vector<16x64xf32> to vector<1x64xf32>
    %c2 = arith.constant 2 : index
    %c0_16 = arith.constant 0 : index
    %c0_17 = arith.constant 0 : index
    %21 = vector.load %arg4[%c2, %c0_16, %c0_17] : memref<16x64x20xf32, #tpu.memory_space<vmem>>, vector<1x64x20xf32>
    %22 = vector.shape_cast %21 : vector<1x64x20xf32> to vector<64x20xf32>
    %cst_18 = arith.constant dense<0.000000e+00> : vector<1x20xf32>
    %23 = tpu.matmul %20, %22, %cst_18 {dimension_numbers = #tpu.dot_dimension_numbers<[1], [0], [0], [1], [0, 0, 1, 1], [], []>} : vector<1x64xf32>, vector<64x20xf32>, vector<1x20xf32> -> vector<1x20xf32>
    %24 = arith.addf %19, %23 : vector<1x20xf32>
    %25 = vector.extract_strided_slice %8 {offsets = [3, 0], sizes = [1, 64], strides = [1, 1]} : vector<16x64xf32> to vector<1x64xf32>
    %c3 = arith.constant 3 : index
    %c0_19 = arith.constant 0 : index
    %c0_20 = arith.constant 0 : index
    %26 = vector.load %arg4[%c3, %c0_19, %c0_20] : memref<16x64x20xf32, #tpu.memory_space<vmem>>, vector<1x64x20xf32>
    %27 = vector.shape_cast %26 : vector<1x64x20xf32> to vector<64x20xf32>
    %cst_21 = arith.constant dense<0.000000e+00> : vector<1x20xf32>
    %28 = tpu.matmul %25, %27, %cst_21 {dimension_numbers = #tpu.dot_dimension_numbers<[1], [0], [0], [1], [0, 0, 1, 1], [], []>} : vector<1x64xf32>, vector<64x20xf32>, vector<1x20xf32> -> vector<1x20xf32>
    %29 = arith.addf %24, %28 : vector<1x20xf32>
    %30 = vector.extract_strided_slice %8 {offsets = [4, 0], sizes = [1, 64], strides = [1, 1]} : vector<16x64xf32> to vector<1x64xf32>
    %c4 = arith.constant 4 : index
    %c0_22 = arith.constant 0 : index
    %c0_23 = arith.constant 0 : index
    %31 = vector.load %arg4[%c4, %c0_22, %c0_23] : memref<16x64x20xf32, #tpu.memory_space<vmem>>, vector<1x64x20xf32>
    %32 = vector.shape_cast %31 : vector<1x64x20xf32> to vector<64x20xf32>
    %cst_24 = arith.constant dense<0.000000e+00> : vector<1x20xf32>
    %33 = tpu.matmul %30, %32, %cst_24 {dimension_numbers = #tpu.dot_dimension_numbers<[1], [0], [0], [1], [0, 0, 1, 1], [], []>} : vector<1x64xf32>, vector<64x20xf32>, vector<1x20xf32> -> vector<1x20xf32>
    %34 = arith.addf %29, %33 : vector<1x20xf32>
    %35 = vector.extract_strided_slice %8 {offsets = [5, 0], sizes = [1, 64], strides = [1, 1]} : vector<16x64xf32> to vector<1x64xf32>
    %c5 = arith.constant 5 : index
    %c0_25 = arith.constant 0 : index
    %c0_26 = arith.constant 0 : index
    %36 = vector.load %arg4[%c5, %c0_25, %c0_26] : memref<16x64x20xf32, #tpu.memory_space<vmem>>, vector<1x64x20xf32>
    %37 = vector.shape_cast %36 : vector<1x64x20xf32> to vector<64x20xf32>
    %cst_27 = arith.constant dense<0.000000e+00> : vector<1x20xf32>
    %38 = tpu.matmul %35, %37, %cst_27 {dimension_numbers = #tpu.dot_dimension_numbers<[1], [0], [0], [1], [0, 0, 1, 1], [], []>} : vector<1x64xf32>, vector<64x20xf32>, vector<1x20xf32> -> vector<1x20xf32>
    %39 = arith.addf %34, %38 : vector<1x20xf32>
    %40 = vector.extract_strided_slice %8 {offsets = [6, 0], sizes = [1, 64], strides = [1, 1]} : vector<16x64xf32> to vector<1x64xf32>
    %c6 = arith.constant 6 : index
    %c0_28 = arith.constant 0 : index
    %c0_29 = arith.constant 0 : index
    %41 = vector.load %arg4[%c6, %c0_28, %c0_29] : memref<16x64x20xf32, #tpu.memory_space<vmem>>, vector<1x64x20xf32>
    %42 = vector.shape_cast %41 : vector<1x64x20xf32> to vector<64x20xf32>
    %cst_30 = arith.constant dense<0.000000e+00> : vector<1x20xf32>
    %43 = tpu.matmul %40, %42, %cst_30 {dimension_numbers = #tpu.dot_dimension_numbers<[1], [0], [0], [1], [0, 0, 1, 1], [], []>} : vector<1x64xf32>, vector<64x20xf32>, vector<1x20xf32> -> vector<1x20xf32>
    %44 = arith.addf %39, %43 : vector<1x20xf32>
    %45 = vector.extract_strided_slice %8 {offsets = [7, 0], sizes = [1, 64], strides = [1, 1]} : vector<16x64xf32> to vector<1x64xf32>
    %c7 = arith.constant 7 : index
    %c0_31 = arith.constant 0 : index
    %c0_32 = arith.constant 0 : index
    %46 = vector.load %arg4[%c7, %c0_31, %c0_32] : memref<16x64x20xf32, #tpu.memory_space<vmem>>, vector<1x64x20xf32>
    %47 = vector.shape_cast %46 : vector<1x64x20xf32> to vector<64x20xf32>
    %cst_33 = arith.constant dense<0.000000e+00> : vector<1x20xf32>
    %48 = tpu.matmul %45, %47, %cst_33 {dimension_numbers = #tpu.dot_dimension_numbers<[1], [0], [0], [1], [0, 0, 1, 1], [], []>} : vector<1x64xf32>, vector<64x20xf32>, vector<1x20xf32> -> vector<1x20xf32>
    %49 = arith.addf %44, %48 : vector<1x20xf32>
    %50 = vector.extract_strided_slice %8 {offsets = [8, 0], sizes = [1, 64], strides = [1, 1]} : vector<16x64xf32> to vector<1x64xf32>
    %c8 = arith.constant 8 : index
    %c0_34 = arith.constant 0 : index
    %c0_35 = arith.constant 0 : index
    %51 = vector.load %arg4[%c8, %c0_34, %c0_35] : memref<16x64x20xf32, #tpu.memory_space<vmem>>, vector<1x64x20xf32>
    %52 = vector.shape_cast %51 : vector<1x64x20xf32> to vector<64x20xf32>
    %cst_36 = arith.constant dense<0.000000e+00> : vector<1x20xf32>
    %53 = tpu.matmul %50, %52, %cst_36 {dimension_numbers = #tpu.dot_dimension_numbers<[1], [0], [0], [1], [0, 0, 1, 1], [], []>} : vector<1x64xf32>, vector<64x20xf32>, vector<1x20xf32> -> vector<1x20xf32>
    %54 = arith.addf %49, %53 : vector<1x20xf32>
    %55 = vector.extract_strided_slice %8 {offsets = [9, 0], sizes = [1, 64], strides = [1, 1]} : vector<16x64xf32> to vector<1x64xf32>
    %c9 = arith.constant 9 : index
    %c0_37 = arith.constant 0 : index
    %c0_38 = arith.constant 0 : index
    %56 = vector.load %arg4[%c9, %c0_37, %c0_38] : memref<16x64x20xf32, #tpu.memory_space<vmem>>, vector<1x64x20xf32>
    %57 = vector.shape_cast %56 : vector<1x64x20xf32> to vector<64x20xf32>
    %cst_39 = arith.constant dense<0.000000e+00> : vector<1x20xf32>
    %58 = tpu.matmul %55, %57, %cst_39 {dimension_numbers = #tpu.dot_dimension_numbers<[1], [0], [0], [1], [0, 0, 1, 1], [], []>} : vector<1x64xf32>, vector<64x20xf32>, vector<1x20xf32> -> vector<1x20xf32>
    %59 = arith.addf %54, %58 : vector<1x20xf32>
    %60 = vector.extract_strided_slice %8 {offsets = [10, 0], sizes = [1, 64], strides = [1, 1]} : vector<16x64xf32> to vector<1x64xf32>
    %c10 = arith.constant 10 : index
    %c0_40 = arith.constant 0 : index
    %c0_41 = arith.constant 0 : index
    %61 = vector.load %arg4[%c10, %c0_40, %c0_41] : memref<16x64x20xf32, #tpu.memory_space<vmem>>, vector<1x64x20xf32>
    %62 = vector.shape_cast %61 : vector<1x64x20xf32> to vector<64x20xf32>
    %cst_42 = arith.constant dense<0.000000e+00> : vector<1x20xf32>
    %63 = tpu.matmul %60, %62, %cst_42 {dimension_numbers = #tpu.dot_dimension_numbers<[1], [0], [0], [1], [0, 0, 1, 1], [], []>} : vector<1x64xf32>, vector<64x20xf32>, vector<1x20xf32> -> vector<1x20xf32>
    %64 = arith.addf %59, %63 : vector<1x20xf32>
    %65 = vector.extract_strided_slice %8 {offsets = [11, 0], sizes = [1, 64], strides = [1, 1]} : vector<16x64xf32> to vector<1x64xf32>
    %c11 = arith.constant 11 : index
    %c0_43 = arith.constant 0 : index
    %c0_44 = arith.constant 0 : index
    %66 = vector.load %arg4[%c11, %c0_43, %c0_44] : memref<16x64x20xf32, #tpu.memory_space<vmem>>, vector<1x64x20xf32>
    %67 = vector.shape_cast %66 : vector<1x64x20xf32> to vector<64x20xf32>
    %cst_45 = arith.constant dense<0.000000e+00> : vector<1x20xf32>
    %68 = tpu.matmul %65, %67, %cst_45 {dimension_numbers = #tpu.dot_dimension_numbers<[1], [0], [0], [1], [0, 0, 1, 1], [], []>} : vector<1x64xf32>, vector<64x20xf32>, vector<1x20xf32> -> vector<1x20xf32>
    %69 = arith.addf %64, %68 : vector<1x20xf32>
    %70 = vector.extract_strided_slice %8 {offsets = [12, 0], sizes = [1, 64], strides = [1, 1]} : vector<16x64xf32> to vector<1x64xf32>
    %c12 = arith.constant 12 : index
    %c0_46 = arith.constant 0 : index
    %c0_47 = arith.constant 0 : index
    %71 = vector.load %arg4[%c12, %c0_46, %c0_47] : memref<16x64x20xf32, #tpu.memory_space<vmem>>, vector<1x64x20xf32>
    %72 = vector.shape_cast %71 : vector<1x64x20xf32> to vector<64x20xf32>
    %cst_48 = arith.constant dense<0.000000e+00> : vector<1x20xf32>
    %73 = tpu.matmul %70, %72, %cst_48 {dimension_numbers = #tpu.dot_dimension_numbers<[1], [0], [0], [1], [0, 0, 1, 1], [], []>} : vector<1x64xf32>, vector<64x20xf32>, vector<1x20xf32> -> vector<1x20xf32>
    %74 = arith.addf %69, %73 : vector<1x20xf32>
    %75 = vector.extract_strided_slice %8 {offsets = [13, 0], sizes = [1, 64], strides = [1, 1]} : vector<16x64xf32> to vector<1x64xf32>
    %c13 = arith.constant 13 : index
    %c0_49 = arith.constant 0 : index
    %c0_50 = arith.constant 0 : index
    %76 = vector.load %arg4[%c13, %c0_49, %c0_50] : memref<16x64x20xf32, #tpu.memory_space<vmem>>, vector<1x64x20xf32>
    %77 = vector.shape_cast %76 : vector<1x64x20xf32> to vector<64x20xf32>
    %cst_51 = arith.constant dense<0.000000e+00> : vector<1x20xf32>
    %78 = tpu.matmul %75, %77, %cst_51 {dimension_numbers = #tpu.dot_dimension_numbers<[1], [0], [0], [1], [0, 0, 1, 1], [], []>} : vector<1x64xf32>, vector<64x20xf32>, vector<1x20xf32> -> vector<1x20xf32>
    %79 = arith.addf %74, %78 : vector<1x20xf32>
    %80 = vector.extract_strided_slice %8 {offsets = [14, 0], sizes = [1, 64], strides = [1, 1]} : vector<16x64xf32> to vector<1x64xf32>
    %c14 = arith.constant 14 : index
    %c0_52 = arith.constant 0 : index
    %c0_53 = arith.constant 0 : index
    %81 = vector.load %arg4[%c14, %c0_52, %c0_53] : memref<16x64x20xf32, #tpu.memory_space<vmem>>, vector<1x64x20xf32>
    %82 = vector.shape_cast %81 : vector<1x64x20xf32> to vector<64x20xf32>
    %cst_54 = arith.constant dense<0.000000e+00> : vector<1x20xf32>
    %83 = tpu.matmul %80, %82, %cst_54 {dimension_numbers = #tpu.dot_dimension_numbers<[1], [0], [0], [1], [0, 0, 1, 1], [], []>} : vector<1x64xf32>, vector<64x20xf32>, vector<1x20xf32> -> vector<1x20xf32>
    %84 = arith.addf %79, %83 : vector<1x20xf32>
    %85 = vector.extract_strided_slice %8 {offsets = [15, 0], sizes = [1, 64], strides = [1, 1]} : vector<16x64xf32> to vector<1x64xf32>
    %c15 = arith.constant 15 : index
    %c0_55 = arith.constant 0 : index
    %c0_56 = arith.constant 0 : index
    %86 = vector.load %arg4[%c15, %c0_55, %c0_56] : memref<16x64x20xf32, #tpu.memory_space<vmem>>, vector<1x64x20xf32>
    %87 = vector.shape_cast %86 : vector<1x64x20xf32> to vector<64x20xf32>
    %cst_57 = arith.constant dense<0.000000e+00> : vector<1x20xf32>
    %88 = tpu.matmul %85, %87, %cst_57 {dimension_numbers = #tpu.dot_dimension_numbers<[1], [0], [0], [1], [0, 0, 1, 1], [], []>} : vector<1x64xf32>, vector<64x20xf32>, vector<1x20xf32> -> vector<1x20xf32>
    %89 = arith.addf %84, %88 : vector<1x20xf32>
    %90 = math.tanh %89 : vector<1x20xf32>
    %c0_58 = arith.constant 0 : index
    %c0_59 = arith.constant 0 : index
    %91 = vector.load %arg6[%c0_58, %c0_59] : memref<20x20xf32, #tpu.memory_space<vmem>>, vector<20x20xf32>
    %cst_60 = arith.constant dense<0.000000e+00> : vector<1x20xf32>
    %92 = tpu.matmul %90, %91, %cst_60 {dimension_numbers = #tpu.dot_dimension_numbers<[1], [0], [0], [1], [0, 0, 1, 1], [], []>} : vector<1x20xf32>, vector<20x20xf32>, vector<1x20xf32> -> vector<1x20xf32>
    %c0_61 = arith.constant 0 : index
    %c0_62 = arith.constant 0 : index
    %93 = vector.load %arg7[%c0_61, %c0_62] : memref<1x20xf32, #tpu.memory_space<vmem>>, vector<1x20xf32>
    %94 = arith.addf %92, %93 : vector<1x20xf32>
    %95 = math.tanh %94 : vector<1x20xf32>
    %c0_63 = arith.constant 0 : index
    %c0_64 = arith.constant 0 : index
    %96 = vector.load %arg8[%c0_63, %c0_64] : memref<20x128xf32, #tpu.memory_space<vmem>>, vector<20x128xf32>
    %cst_65 = arith.constant dense<0.000000e+00> : vector<1x128xf32>
    %97 = tpu.matmul %95, %96, %cst_65 {dimension_numbers = #tpu.dot_dimension_numbers<[1], [0], [0], [1], [0, 0, 1, 1], [], []>} : vector<1x20xf32>, vector<20x128xf32>, vector<1x128xf32> -> vector<1x128xf32>
    %c0_66 = arith.constant 0 : index
    %c0_67 = arith.constant 0 : index
    %98 = vector.load %arg9[%c0_66, %c0_67] : memref<1x128xf32, #tpu.memory_space<vmem>>, vector<1x128xf32>
    %99 = arith.addf %97, %98 : vector<1x128xf32>
    %cst_68 = arith.constant dense<0xFF800000> : vector<1xf32>
    %100 = vector.multi_reduction <maximumf>, %99, %cst_68 [1] : vector<1x128xf32> to vector<1xf32>
    %101 = vector.shape_cast %100 : vector<1xf32> to vector<1x1xf32>
    %102 = vector.broadcast %101 : vector<1x1xf32> to vector<1x128xf32>
    %103 = arith.subf %99, %102 : vector<1x128xf32>
    %104 = math.exp %103 : vector<1x128xf32>
    %cst_69 = arith.constant dense<0.000000e+00> : vector<1xf32>
    %105 = vector.multi_reduction <add>, %104, %cst_69 [1] : vector<1x128xf32> to vector<1xf32>
    %106 = vector.shape_cast %105 : vector<1xf32> to vector<1x1xf32>
    %107 = tpu.reciprocal %106 {approx = true} : vector<1x1xf32> -> vector<1x1xf32>
    %108 = vector.broadcast %107 : vector<1x1xf32> to vector<1x128xf32>
    %109 = arith.mulf %104, %108 : vector<1x128xf32>
    %c0_70 = arith.constant 0 : index
    %c0_71 = arith.constant 0 : index
    %c0_72 = arith.constant 0 : index
    %110 = vector.load %arg10[%c0_70, %c0_71, %c0_72] : memref<1x1x128xf32, #tpu.memory_space<vmem>>, vector<1x1x128xf32>
    %111 = vector.shape_cast %110 : vector<1x1x128xf32> to vector<1x128xf32>
    %112 = vector.shape_cast %109 : vector<1x128xf32> to vector<1x1x128xf32>
    tpu.vector_store %arg10[%c0_70, %c0_71, %c0_72], %112 {strides = array<i32>} : memref<1x1x128xf32, #tpu.memory_space<vmem>>, vector<1x1x128xf32>,
    return
  }
  func.func @transform_0(%arg0: i32) -> (i32, i32, i32) {
    %c0_i32 = arith.constant 0 : i32
    %c0_i32_0 = arith.constant 0 : i32
    %c0_i32_1 = arith.constant 0 : i32
    return %arg0, %c0_i32, %c0_i32_0 : i32, i32, i32
  }
  func.func @transform_1(%arg0: i32) -> (i32, i32) {
    %c0_i32 = arith.constant 0 : i32
    %c0_i32_0 = arith.constant 0 : i32
    %c0_i32_1 = arith.constant 0 : i32
    return %c0_i32, %c0_i32_0 : i32, i32
  }
  func.func @transform_2(%arg0: i32) -> (i32, i32) {
    %c0_i32 = arith.constant 0 : i32
    %c0_i32_0 = arith.constant 0 : i32
    %c0_i32_1 = arith.constant 0 : i32
    return %c0_i32, %c0_i32_0 : i32, i32
  }
  func.func @transform_3(%arg0: i32) -> (i32, i32, i32) {
    %c0_i32 = arith.constant 0 : i32
    %c0_i32_0 = arith.constant 0 : i32
    %c0_i32_1 = arith.constant 0 : i32
    %c0_i32_2 = arith.constant 0 : i32
    return %c0_i32, %c0_i32_0, %c0_i32_1 : i32, i32, i32
  }
  func.func @transform_4(%arg0: i32) -> (i32, i32) {
    %c0_i32 = arith.constant 0 : i32
    %c0_i32_0 = arith.constant 0 : i32
    %c0_i32_1 = arith.constant 0 : i32
    return %c0_i32, %c0_i32_0 : i32, i32
  }
  func.func @transform_5(%arg0: i32) -> (i32, i32) {
    %c0_i32 = arith.constant 0 : i32
    %c0_i32_0 = arith.constant 0 : i32
    %c0_i32_1 = arith.constant 0 : i32
    return %c0_i32, %c0_i32_0 : i32, i32
  }
  func.func @transform_6(%arg0: i32) -> (i32, i32) {
    %c0_i32 = arith.constant 0 : i32
    %c0_i32_0 = arith.constant 0 : i32
    %c0_i32_1 = arith.constant 0 : i32
    return %c0_i32, %c0_i32_0 : i32, i32
  }
  func.func @transform_7(%arg0: i32) -> (i32, i32) {
    %c0_i32 = arith.constant 0 : i32
    %c0_i32_0 = arith.constant 0 : i32
    %c0_i32_1 = arith.constant 0 : i32
    return %c0_i32, %c0_i32_0 : i32, i32
  }
  func.func @transform_8(%arg0: i32) -> (i32, i32) {
    %c0_i32 = arith.constant 0 : i32
    %c0_i32_0 = arith.constant 0 : i32
    %c0_i32_1 = arith.constant 0 : i32
    return %c0_i32, %c0_i32_0 : i32, i32
  }
  func.func @transform_9(%arg0: i32) -> (i32, i32, i32) {
    %c0_i32 = arith.constant 0 : i32
    %c0_i32_0 = arith.constant 0 : i32
    %c0_i32_1 = arith.constant 0 : i32
    return %arg0, %c0_i32, %c0_i32_0 : i32, i32, i32
  }
}

</mosaic_0001>

<bundles_post_ra>
// kernel: squeeze.1
= control target key start
LH: loop header
LB: loop body
LE: loop exit
PB: predicated region body
PF: predicated region fallthrough
CT: control target
= control target key end

     0   :  { %s90_s8 = smov 95   ;;  %s91_s9 = smov 73   ;;  %vm7_vm0 = vcmask 89088   ;;  %s156_s0 = inlined_call_operand.vmem [shape: f32[2,121], index: 0, kind: input, shape index: {}]   ;;  %s157_s1 = inlined_call_operand.vmem [shape: f32[2,11,11], index: 1, kind: output, shape index: {}]  }
   0x1   :  { %v4_v0 = vld [vmem:[%s156_s0] sm:$0x3]  ;;  %s89_s0 = smov 117   ;;  %s92_s10 = smov 106  }
   0x2   :  { %5 = vst [vmem:[#allocation0] sm:$0x3] %v4_v0  ;;  %s93_s11 = smov 84   ;;  %s94_s12 = smov 62  }
   0x3   :  { %s95_s13 = smov 51   ;;  %s96_s14 = smov 40  }
   0x4   :  { %s97_s15 = smov 29   ;;  %s98_s16 = smov 18  }
   0x9   :  { %v9_v1 = vld [vmem:[#allocation0] sm:$0x3]  }
   0xa   :  { %v21_v2 = vld [vmem:[#allocation0] sm:$0x3]   ;;  %10 = vrot.lane.b32.xlu0 %v9_v1, %s89_s0 }
   0xb   :  { %22 = vrot.lane.b32.xlu1 %v21_v2, %s90_s8  ;;  %v33_v3 = vld [vmem:[#allocation0] sm:$0x3]  }
   0xc   :  { %34 = vrot.lane.b32.xlu2 %v33_v3, %s91_s9  ;;  %v15_v4 = vld [vmem:[#allocation0] sm:$0x3]  }
   0xd   :  { %v27_v5 = vld [vmem:[#allocation0] sm:$0x3]  }
   0xe   :  { %v39_v6 = vld [vmem:[#allocation0] sm:$0x3]  }
   0xf   :  { %v45_v7 = vld [vmem:[#allocation0] sm:$0x3]  }
  0x10   :  { %v51_v8 = vld [vmem:[#allocation0] sm:$0x3]  }
  0x11   :  { %v57_v9 = vld [vmem:[#allocation0] sm:$0x3]  }
  0x12   :  { %16 = vrot.lane.b32.xlu0 %v15_v4, %s92_s10  ;;  %v63_v10 = vld [vmem:[#allocation0] sm:$0x3]  }
  0x13   :  { %28 = vrot.lane.b32.xlu1 %v27_v5, %s93_s11  ;;  %v6_v11 = vld [vmem:[#allocation0] sm:$0x3]  }
  0x14   :  { %40 = vrot.lane.b32.xlu2 %v39_v6, %s94_s12  ;;  %8 = vst.msk [vmem:[%s157_s1] ss:$16 sm:$0x3] %vm7_vm0, %v6_v11  }
  0x1a   :  { %46 = vrot.lane.b32.xlu0 %v45_v7, %s95_s13 }
  0x1b   :  { %52 = vrot.lane.b32.xlu1 %v51_v8, %s96_s14 }
  0x1c   :  { %58 = vrot.lane.b32.xlu2 %v57_v9, %s97_s15 }
  0x22   :  { %64 = vrot.lane.b32.xlu0 %v63_v10, %s98_s16 }
  0x66   :  { %v35_v12 = vpop.permute.xlu2 %34  }
  0x67   :  { %73 = vst.msk [vmem:[%s157_s1 + $0x5] ss:$16 sm:$0x3] %vm7_vm0, %v35_v12  }
  0x6e   :  { %v41_v13 = vpop.permute.xlu2 %40  }
  0x6f   :  { %74 = vst.msk [vmem:[%s157_s1 + $0x6] ss:$16 sm:$0x3] %vm7_vm0, %v41_v13  }
  0x76   :  { %v59_v14 = vpop.permute.xlu2 %58  }
  0x77   :  { %77 = vst.msk [vmem:[%s157_s1 + $0x9] ss:$16 sm:$0x3] %vm7_vm0, %v59_v14  }
  0x7c   :  { %v11_v15 = vpop.permute.xlu0 %10  }
  0x7d   :  { %v23_v16 = vpop.permute.xlu1 %22   ;;  %69 = vst.msk [vmem:[%s157_s1 + $0x1] ss:$16 sm:$0x3] %vm7_vm0, %v11_v15  }
  0x7e   :  { %71 = vst.msk [vmem:[%s157_s1 + $0x3] ss:$16 sm:$0x3] %vm7_vm0, %v23_v16  }
  0x84   :  { %v17_v17 = vpop.permute.xlu0 %16  }
  0x85   :  { %v29_v18 = vpop.permute.xlu1 %28   ;;  %70 = vst.msk [vmem:[%s157_s1 + $0x2] ss:$16 sm:$0x3] %vm7_vm0, %v17_v17  }
  0x86   :  { %72 = vst.msk [vmem:[%s157_s1 + $0x4] ss:$16 sm:$0x3] %vm7_vm0, %v29_v18  }
  0x8c   :  { %v47_v19 = vpop.permute.xlu0 %46  }
  0x8d   :  { %v53_v20 = vpop.permute.xlu1 %52   ;;  %75 = vst.msk [vmem:[%s157_s1 + $0x7] ss:$16 sm:$0x3] %vm7_vm0, %v47_v19  }
  0x8e   :  { %76 = vst.msk [vmem:[%s157_s1 + $0x8] ss:$16 sm:$0x3] %vm7_vm0, %v53_v20  }
  0x94   :  { %v65_v21 = vpop.permute.xlu0 %64  }
  0x95   :  { %78 = vst.msk [vmem:[%s157_s1 + $0xa] ss:$16 sm:$0x3] %vm7_vm0, %v65_v21  }

// kernel: _lambda_.1
= control target key start
LH: loop header
LB: loop body
LE: loop exit
PB: predicated region body
PF: predicated region fallthrough
CT: control target
= control target key end

     0   :  { %14 = vsyncpa [#allocation3], 0  ;;  %s1226_s30 = smov 0   ;;  %s1320_s0 = inlined_call_operand.vmem [shape: f32[2,36,64], index: 0, kind: input, shape index: {}]   ;;  %s1321_s1 = inlined_call_operand.vmem [shape: f32[16,36], index: 1, kind: input, shape index: {}]   ;;  %s1322_s2 = inlined_call_operand.vmem [shape: f32[16,1], index: 2, kind: input, shape index: {}]   ;;  %s1323_s3 = inlined_call_operand.hbm [shape: f32[16,64,20], index: 3, kind: input, shape index: {}]   ;;  %s1324_s4 = inlined_call_operand.vmem [shape: f32[1,20], index: 4, kind: input, shape index: {}, may-alias: {4,6}]   ;;  %s1325_s5 = inlined_call_operand.vmem [shape: f32[20,20], index: 5, kind: input, shape index: {}]   ;;  %s1326_s6 = inlined_call_operand.vmem [shape: f32[1,20], index: 6, kind: input, shape index: {}, may-alias: {4,6}]   ;;  %s1327_s7 = inlined_call_operand.vmem [shape: f32[20,128], index: 7, kind: input, shape index: {}]   ;;  %s1328_s8 = inlined_call_operand.vmem [shape: f32[1,128], index: 8, kind: input, shape index: {}]   ;;  %s1329_s9 = inlined_call_operand.vmem [shape: f32[2,1,128], index: 9, kind: output, shape index: {}]  }
   0x1 LB: > { %s262_s12 = sshll.u32 %s1323_s3, 4  ;;  %s1065_s13 = sadd.s32 4294967295, %s1170_s30   ;;  %s1170_s30 = sphi %s1226_s30, %s20_s30   ;;  %s263_s12 = int_to_ptr.hbm [resolvable:$true] %s262_s12 }
   0x2   : > { %p1067_p0 = scmp.ge.s32.totalorder %s1170_s30, 1  ;;  %p245_p1 = scmp.lt.s32.totalorder %s1170_s30, 3 }
   0x3   : > { %p1107_p2 = scmp.eq.s32.totalorder %s1065_s13, 0  ;;  %s1172_s14 = smov [#allocation2]  }
   0x4   : > { %p246_p3 = pnand %p1067_p0, %p245_p1  ;;  %s264_s15 = sshll.u32 %s1172_s14, 4  ;;  %s265_s15 = int_to_ptr.vmem [resolvable:$true] %s264_s15 }
   0x5   : > { %s1173_s16 = smov 128   ;;  %s1174_s17 = smov 8  }
   0x6   : > { %p1103_p4 = pneg %p246_p3  ;;  %303 = sbr.rel (%p246_p3) target bundleno = 866 (0x362), region = 56 }
   0x8   : > { %p1104_p5 = pnand %p1107_p2, %p1103_p4 }
   0xa   : > { %1106 = dma.hbm_to_vmem [thread:$0]  (!%p1104_p5), %s263_s12, 16384, %s265_s15, [#allocation3], %s1173_s16, %s1173_s16, %s1174_s17  }
   0xb   : > { %1165 = dma.done.wait (%p1107_p2), [#allocation3], 16384  }
   0xc   : > { %1167 = vsyncadd (%p1107_p2), [#allocation3], 4294950912  ;;  %p338_p6 = scmp.lt.s32.totalorder %s1065_s13, 1  ;;  %v1175_v0 = vmov 0   ;;  %vm372_vm0 = vcmask 1043456   ;;  %v353_v4 = vld [vmem:[%s1322_s2] sm:$0xff] }
   0xd   : > { %1121 = vset.pattern.permute.xlu0 %v1175_v0  ;;  %v409_v5 = vld [vmem:[#allocation2 + $0x38] sm:$0xff]  ;;  %v408_v6 = vld [vmem:[#allocation2 + $0x30] sm:$0xff]  ;;  %v407_v10 = vld [vmem:[#allocation2 + $0x28] sm:$0xff]  ;;  %vm365_vm1 = vcmask 293888   ;;  %vm410_vm2 = vcmask 523264   ;;  %vm935_vm3 = vcmask 162816  }
   0xe   : > { %s1331_s13 = smov (!%p338_p6, %s1065_s13), 1  ;;  %357 = vperm.xlu0 %1121, %v353_v4   ;;  %v443_v7 = vld [vmem:[#allocation2 + $0x78] sm:$0xff]  ;;  %422 = vmatpush.msra.mxu1 %v409_v5  ;;  %v442_v11 = vld [vmem:[#allocation2 + $0x70] sm:$0xff]  ;;  %v441_v14 = vld [vmem:[#allocation2 + $0x68] sm:$0xff]  ;;  %vm993_vm4 = vcmask 1040384  }
   0xf   : > { %s1098_s18 = smul.u32 40, %s1331_s13  ;;  %455 = vmatpush.msra.mxu2 %v443_v7  ;;  %v476_v9 = vld [vmem:[#allocation2 + $0xb8] sm:$0xff]  ;;  %v475_v12 = vld [vmem:[#allocation2 + $0xb0] sm:$0xff]  ;;  %v474_v15 = vld [vmem:[#allocation2 + $0xa8] sm:$0xff]  ;;  %s345_s11 = scalar_lea.vmem %s1329_s9, %s1331_s13 }
  0x10   : > { %488 = vmatpush.msra.mxu3 %v476_v9  ;;  %423 = vmatpush.msra.mxu1 %v408_v6  ;;  %v351_v16 = vld [vmem:[%s1321_s1] sm:$0xff]  ;;  %v354_v18 = vld [vmem:[%s1322_s2 + $0x8] sm:$0xff]  ;;  %v509_v19 = vld [vmem:[#allocation2 + $0xf8] sm:$0xff] }
  0x11   : > { %s342_s21 = scalar_lea.vmem %s1320_s0, %s1098_s18  ;;  %456 = vmatpush.msra.mxu2 %v442_v11  ;;  %v406_v17 = vld [vmem:[#allocation2 + $0x20] sm:$0xff]  ;;  %v405_v20 = vld [vmem:[#allocation2 + $0x18] sm:$0xff]  ;;  %v508_v22 = vld [vmem:[#allocation2 + $0xf0] sm:$0xff] }
  0x12   : > { %v350_v1 = vld [vmem:[%s342_s21 + $0x20] sm:$0xf]  ;;  %v349_v2 = vld [vmem:[%s342_s21 + $0x18] sm:$0xff]  ;;  %v348_v3 = vld [vmem:[%s342_s21 + $0x10] sm:$0xff]  ;;  %489 = vmatpush.msra.mxu3 %v475_v12  ;;  %424 = vmatpush.msra.mxu1 %v407_v10 }
  0x13   : > { %1073 = vmatpush.msk.msra.mxu0 %vm372_vm0, %v350_v1  ;;  %v347_v8 = vld [vmem:[%s342_s21 + $0x8] sm:$0xff]  ;;  %v346_v13 = vld [vmem:[%s342_s21] sm:$0xff]  ;;  %457 = vmatpush.msra.mxu2 %v441_v14  ;;  %v404_v24 = vld [vmem:[#allocation2 + $0x10] sm:$0xff] }
  0x14   : > { %490 = vmatpush.msra.mxu3 %v474_v15  ;;  %v440_v21 = vld [vmem:[#allocation2 + $0x60] sm:$0xff]  ;;  %425 = vmatpush.msra.mxu1 %v406_v17  ;;  %v439_v25 = vld [vmem:[#allocation2 + $0x58] sm:$0xff]  ;;  %v507_v26 = vld [vmem:[#allocation2 + $0xe8] sm:$0xff] }
  0x15   : > { %388 = vmatpush.msra.mxu0 %v349_v2  ;;  %v473_v23 = vld [vmem:[#allocation2 + $0xa0] sm:$0xff]  ;;  %458 = vmatpush.msra.mxu2 %v440_v21  ;;  %v472_v27 = vld [vmem:[#allocation2 + $0x98] sm:$0xff]  ;;  %v403_v28 = vld [vmem:[#allocation2 + $0x8] sm:$0xff] }
  0x16   : > { %362 = vperm.xlu0 %1121, %v354_v18   ;;  %426 = vmatpush.msra.mxu1 %v405_v20  ;;  %v438_v29 = vld [vmem:[#allocation2 + $0x50] sm:$0xff]  ;;  %v506_v30 = vld [vmem:[#allocation2 + $0xe0] sm:$0xff]  ;;  %v352_v32 = vld [vmem:[%s1321_s1 + $0x8] sm:$0xff] }
  0x17   : > { %389 = vmatpush.msra.mxu0 %v348_v3  ;;  %491 = vmatpush.msra.mxu3 %v473_v23  ;;  %v471_v31 = vld [vmem:[#allocation2 + $0x90] sm:$0xff]  ;;  %v402_v33 = vld [vmem:[#allocation2] sm:$0xff]  ;;  %v505_v34 = vld [vmem:[#allocation2 + $0xd8] sm:$0xff] }
  0x18   : > { %427 = vmatpush.msra.mxu1 %v404_v24  ;;  %459 = vmatpush.msra.mxu2 %v439_v25  ;;  %v437_v35 = vld [vmem:[#allocation2 + $0x48] sm:$0xff]  ;;  %v542_v37 = vld [vmem:[#allocation2 + $0x138] sm:$0xff]  ;;  %v504_v38 = vld [vmem:[#allocation2 + $0xd0] sm:$0xff] }
  0x19   : > { %390 = vmatpush.msra.mxu0 %v347_v8  ;;  %492 = vmatpush.msra.mxu3 %v472_v27  ;;  %v470_v36 = vld [vmem:[#allocation2 + $0x88] sm:$0xff]  ;;  %v436_v39 = vld [vmem:[#allocation2 + $0x40] sm:$0xff]  ;;  %v541_v41 = vld [vmem:[#allocation2 + $0x130] sm:$0xff] }
  0x1a   : > { %428 = vmatpush.msra.mxu1 %v403_v28  ;;  %460 = vmatpush.msra.mxu2 %v438_v29  ;;  %v469_v40 = vld [vmem:[#allocation2 + $0x80] sm:$0xff]  ;;  %v503_v42 = vld [vmem:[#allocation2 + $0xc8] sm:$0xff]  ;;  %v575_v43 = vld [vmem:[#allocation2 + $0x178] sm:$0xff] }
  0x1b   : > { %391 = vmatpush.msra.mxu0 %v346_v13  ;;  %493 = vmatpush.msra.mxu3 %v471_v31  ;;  %v608_v44 = vld [vmem:[#allocation2 + $0x1b8] sm:$0xff]  ;;  %v502_v45 = vld [vmem:[#allocation2 + $0xc0] sm:$0xff]  ;;  %v540_v47 = vld [vmem:[#allocation2 + $0x128] sm:$0xff] }
  0x1c   : > { %1074 = vmatmul.msk.f32.vlgmr.msra.gmra.mxu0 %vm365_vm1, %v351_v16  ;;  %429 = vmatpush.msra.mxu1 %v402_v33  ;;  %v641_v46 = vld [vmem:[#allocation2 + $0x1f8] sm:$0xff]  ;;  %v574_v48 = vld [vmem:[#allocation2 + $0x170] sm:$0xff]  ;;  %v539_v51 = vld [vmem:[#allocation2 + $0x120] sm:$0xff] }
  0x1d   : > { %521 = vmatpush.msrb.mxu0 %v509_v19  ;;  %461 = vmatpush.msra.mxu2 %v437_v35  ;;  %v607_v49 = vld [vmem:[#allocation2 + $0x1b0] sm:$0xff]  ;;  %v573_v52 = vld [vmem:[#allocation2 + $0x168] sm:$0xff]  ;;  %v538_v55 = vld [vmem:[#allocation2 + $0x118] sm:$0xff] }
  0x1e   : > { %494 = vmatpush.msra.mxu3 %v470_v36  ;;  %554 = vmatpush.msrb.mxu1 %v542_v37  ;;  %v640_v50 = vld [vmem:[#allocation2 + $0x1f0] sm:$0xff]  ;;  %v606_v53 = vld [vmem:[#allocation2 + $0x1a8] sm:$0xff]  ;;  %v572_v56 = vld [vmem:[#allocation2 + $0x160] sm:$0xff] }
  0x1f   : > { %522 = vmatpush.msrb.mxu0 %v508_v22  ;;  %462 = vmatpush.msra.mxu2 %v436_v39  ;;  %v639_v54 = vld [vmem:[#allocation2 + $0x1e8] sm:$0xff]  ;;  %v605_v57 = vld [vmem:[#allocation2 + $0x1a0] sm:$0xff]  ;;  %v537_v59 = vld [vmem:[#allocation2 + $0x110] sm:$0xff] }
  0x20   : > { %495 = vmatpush.msra.mxu3 %v469_v40  ;;  %555 = vmatpush.msrb.mxu1 %v541_v41  ;;  %v638_v58 = vld [vmem:[#allocation2 + $0x1e0] sm:$0xff]  ;;  %v571_v60 = vld [vmem:[#allocation2 + $0x158] sm:$0xff]  ;;  %v536_v63 = vld [vmem:[#allocation2 + $0x108] sm:$0xff] }
  0x21   : > { %523 = vmatpush.msrb.mxu0 %v507_v26  ;;  %587 = vmatpush.msrb.mxu2 %v575_v43  ;;  %v604_v61 = vld [vmem:[#allocation2 + $0x198] sm:$0xff]  ;;  %v570_v0 = vld [vmem:[#allocation2 + $0x150] sm:$0xff]  ;;  %v535_v3 = vld [vmem:[#allocation2 + $0x100] sm:$0xff] }
  0x22   : > { %620 = vmatpush.msrb.mxu3 %v608_v44  ;;  %556 = vmatpush.msrb.mxu1 %v540_v47  ;;  %v637_v62 = vld [vmem:[#allocation2 + $0x1d8] sm:$0xff]  ;;  %v603_v1 = vld [vmem:[#allocation2 + $0x190] sm:$0xff]  ;;  %v569_v4 = vld [vmem:[#allocation2 + $0x148] sm:$0xff] }
  0x23   : > { %524 = vmatpush.msrb.mxu0 %v506_v30  ;;  %588 = vmatpush.msrb.mxu2 %v574_v48  ;;  %v636_v2 = vld [vmem:[#allocation2 + $0x1d0] sm:$0xff]  ;;  %v602_v5 = vld [vmem:[#allocation2 + $0x188] sm:$0xff]  ;;  %v568_v7 = vld [vmem:[#allocation2 + $0x140] sm:$0xff] }
  0x24   : > { %1075 = vmatmul.msk.f32.gmra.mxu0 %vm365_vm1, %v352_v32  ;;  %621 = vmatpush.msrb.mxu3 %v607_v49  ;;  %v635_v6 = vld [vmem:[#allocation2 + $0x1c8] sm:$0xff]  ;;  %v601_v8 = vld [vmem:[#allocation2 + $0x180] sm:$0xff]  ;;  %v674_v14 = vld [vmem:[#allocation2 + $0x238] sm:$0xff] }
  0x25   : > { %525 = vmatpush.msrb.mxu0 %v505_v34  ;;  %557 = vmatpush.msrb.mxu1 %v539_v51  ;;  %v634_v9 = vld [vmem:[#allocation2 + $0x1c0] sm:$0xff]  ;;  %v673_v18 = vld [vmem:[#allocation2 + $0x230] sm:$0xff]  ;;  %v707_v19 = vld [vmem:[#allocation2 + $0x278] sm:$0xff] }
  0x26   : > { %589 = vmatpush.msrb.mxu2 %v573_v52  ;;  %622 = vmatpush.msrb.mxu3 %v606_v53  ;;  %v740_v20 = vld [vmem:[#allocation2 + $0x2b8] sm:$0xff]  ;;  %v672_v22 = vld [vmem:[#allocation2 + $0x228] sm:$0xff]  ;;  %v706_v23 = vld [vmem:[#allocation2 + $0x270] sm:$0xff] }
  0x27   : > { %526 = vmatpush.msrb.mxu0 %v504_v38  ;;  %558 = vmatpush.msrb.mxu1 %v538_v55  ;;  %v773_v21 = vld [vmem:[#allocation2 + $0x2f8] sm:$0xff]  ;;  %v739_v24 = vld [vmem:[#allocation2 + $0x2b0] sm:$0xff]  ;;  %v671_v26 = vld [vmem:[#allocation2 + $0x220] sm:$0xff] }
  0x28   : > { %590 = vmatpush.msrb.mxu2 %v572_v56  ;;  %623 = vmatpush.msrb.mxu3 %v605_v57  ;;  %v772_v25 = vld [vmem:[#allocation2 + $0x2f0] sm:$0xff]  ;;  %v705_v27 = vld [vmem:[#allocation2 + $0x268] sm:$0xff]  ;;  %v670_v31 = vld [vmem:[#allocation2 + $0x218] sm:$0xff] }
  0x29   : > { %527 = vmatpush.msrb.mxu0 %v503_v42  ;;  %559 = vmatpush.msrb.mxu1 %v537_v59  ;;  %v738_v28 = vld [vmem:[#allocation2 + $0x2a8] sm:$0xff]  ;;  %v704_v32 = vld [vmem:[#allocation2 + $0x260] sm:$0xff]  ;;  %v669_v37 = vld [vmem:[#allocation2 + $0x210] sm:$0xff] }
  0x2a   : > { %591 = vmatpush.msrb.mxu2 %v571_v60  ;;  %624 = vmatpush.msrb.mxu3 %v604_v61  ;;  %v771_v29 = vld [vmem:[#allocation2 + $0x2e8] sm:$0xff]  ;;  %v737_v33 = vld [vmem:[#allocation2 + $0x2a0] sm:$0xff]  ;;  %v703_v40 = vld [vmem:[#allocation2 + $0x258] sm:$0xff] }
  0x2b   : > { %528 = vmatpush.msrb.mxu0 %v502_v45  ;;  %560 = vmatpush.msrb.mxu1 %v536_v63  ;;  %v770_v34 = vld [vmem:[#allocation2 + $0x2e0] sm:$0xff]  ;;  %v736_v41 = vld [vmem:[#allocation2 + $0x298] sm:$0xff]  ;;  %v668_v43 = vld [vmem:[#allocation2 + $0x208] sm:$0xff] }
  0x2c   : > { %592 = vmatpush.msrb.mxu2 %v570_v0  ;;  %625 = vmatpush.msrb.mxu3 %v603_v1  ;;  %v769_v42 = vld [vmem:[#allocation2 + $0x2d8] sm:$0xff]  ;;  %v702_v45 = vld [vmem:[#allocation2 + $0x250] sm:$0xff]  ;;  %v667_v49 = vld [vmem:[#allocation2 + $0x200] sm:$0xff] }
  0x2d   : > { %653 = vmatpush.msra.mxu0 %v641_v46  ;;  %561 = vmatpush.msrb.mxu1 %v535_v3  ;;  %v735_v46 = vld [vmem:[#allocation2 + $0x290] sm:$0xff]  ;;  %v734_v51 = vld [vmem:[#allocation2 + $0x288] sm:$0xff]  ;;  %v806_v53 = vld [vmem:[#allocation2 + $0x338] sm:$0xff] }
  0x2e   : > { %593 = vmatpush.msrb.mxu2 %v569_v4  ;;  %626 = vmatpush.msrb.mxu3 %v602_v5  ;;  %v768_v48 = vld [vmem:[#allocation2 + $0x2d0] sm:$0xff]  ;;  %v767_v52 = vld [vmem:[#allocation2 + $0x2c8] sm:$0xff]  ;;  %v733_v56 = vld [vmem:[#allocation2 + $0x280] sm:$0xff] }
  0x2f   : > { %654 = vmatpush.msra.mxu0 %v640_v50  ;;  %v701_v50 = vld [vmem:[#allocation2 + $0x248] sm:$0xff]  ;;  %v766_v57 = vld [vmem:[#allocation2 + $0x2c0] sm:$0xff]  ;;  %v839_v59 = vld [vmem:[#allocation2 + $0x378] sm:$0xff] }
  0x30   : > { %594 = vmatpush.msrb.mxu2 %v568_v7  ;;  %627 = vmatpush.msrb.mxu3 %v601_v8  ;;  %v872_v60 = vld [vmem:[#allocation2 + $0x3b8] sm:$0xff]  ;;  %v804_v0 = vld [vmem:[#allocation2 + $0x328] sm:$0xff]  ;;  %v871_v3 = vld [vmem:[#allocation2 + $0x3b0] sm:$0xff] }
  0x31   : > { %655 = vmatpush.msra.mxu0 %v639_v54  ;;  %v700_v54 = vld [vmem:[#allocation2 + $0x240] sm:$0xff]  ;;  %v905_v61 = vld [vmem:[#allocation2 + $0x3f8] sm:$0xff]  ;;  %v904_v4 = vld [vmem:[#allocation2 + $0x3f0] sm:$0xff] }
  0x32   : > { %v803_v5 = vld [vmem:[#allocation2 + $0x320] sm:$0xff]  ;;  %v870_v7 = vld [vmem:[#allocation2 + $0x3a8] sm:$0xff] }
  0x33   : > { %656 = vmatpush.msra.mxu0 %v638_v58  ;;  %v805_v58 = vld [vmem:[#allocation2 + $0x330] sm:$0xff]  ;;  %v903_v8 = vld [vmem:[#allocation2 + $0x3e8] sm:$0xff] }
  0x35   : > { %657 = vmatpush.msra.mxu0 %v637_v62 }
  0x37   : > { %658 = vmatpush.msra.mxu0 %v636_v2  ;;  %v838_v2 = vld [vmem:[#allocation2 + $0x370] sm:$0xff] }
  0x39   : > { %659 = vmatpush.msra.mxu0 %v635_v6  ;;  %v837_v6 = vld [vmem:[#allocation2 + $0x368] sm:$0xff] }
  0x3b   : > { %660 = vmatpush.msra.mxu0 %v634_v9  ;;  %v802_v9 = vld [vmem:[#allocation2 + $0x318] sm:$0xff] }
  0x80   : > { %v358_v10 = vpop.permute.xlu0 %357 }
  0x88   : > { %v363_v44 = vpop.permute.xlu0 %362 }
  0x99   : > { %v393_v11 = vpop.f32.mrf.mxu0 }
  0x9a   : > { %v394_v12 = vadd.f32 %v393_v11, %v358_v10  ;;  %v836_v10 = vld [vmem:[#allocation2 + $0x360] sm:$0xff] }
  0x9b   : > { %v869_v11 = vld [vmem:[#allocation2 + $0x3a0] sm:$0xff] }
  0x9c   : > { %v399_v13 = vmax.f32 %v394_v12, 0.0  ;;  %v902_v12 = vld [vmem:[#allocation2 + $0x3e0] sm:$0xff] }
  0x9e   : > { %1076 = vmatmul.msk.f32.vlgmr.msra.gmra.mxu1 %vm410_vm2, %v399_v13  ;;  %v444_v15 = vrot.slane %v399_v13, 1  ;;  %v477_v16 = vrot.slane %v399_v13, 2  ;;  %v510_v17 = vrot.slane %v399_v13, 3  ;;  %v543_v30 = vrot.slane %v399_v13, 4 }
  0x9f   : > { %686 = vmatpush.msra.mxu1 %v674_v14  ;;  %v576_v35 = vrot.slane %v399_v13, 5  ;;  %v609_v36 = vrot.slane %v399_v13, 6  ;;  %v642_v39 = vrot.slane %v399_v13, 7  ;;  %v801_v13 = vld [vmem:[#allocation2 + $0x310] sm:$0xff]  ;;  %v835_v14 = vld [vmem:[#allocation2 + $0x358] sm:$0xff] }
  0xa0   : > { %1077 = vmatmul.msk.f32.vlgmr.msra.gmra.mxu2 %vm410_vm2, %v444_v15  ;;  %1078 = vmatmul.msk.f32.vlgmr.msra.gmra.mxu3 %vm410_vm2, %v477_v16  ;;  %v868_v15 = vld [vmem:[#allocation2 + $0x398] sm:$0xff] }
  0xa1   : > { %1079 = vmatmul.msk.f32.vlgmr.msrb.gmra.mxu0 %vm410_vm2, %v510_v17  ;;  %687 = vmatpush.msra.mxu1 %v673_v18  ;;  %v396_v38 = vpop.f32.mrf.mxu0  ;;  %v901_v16 = vld [vmem:[#allocation2 + $0x3d8] sm:$0xff]  ;;  %v800_v17 = vld [vmem:[#allocation2 + $0x308] sm:$0xff]  ;;  %v834_v18 = vld [vmem:[#allocation2 + $0x350] sm:$0xff] }
  0xa2   : > { %719 = vmatpush.msra.mxu2 %v707_v19  ;;  %752 = vmatpush.msra.mxu3 %v740_v20  ;;  %v397_v47 = vadd.f32 %v396_v38, %v363_v44  ;;  %v867_v19 = vld [vmem:[#allocation2 + $0x390] sm:$0xff] }
  0xa3   : > { %785 = vmatpush.msrb.mxu0 %v773_v21  ;;  %688 = vmatpush.msra.mxu1 %v672_v22  ;;  %v900_v20 = vld [vmem:[#allocation2 + $0x3d0] sm:$0xff]  ;;  %v799_v21 = vld [vmem:[#allocation2 + $0x300] sm:$0xff]  ;;  %v833_v22 = vld [vmem:[#allocation2 + $0x348] sm:$0xff] }
  0xa4   : > { %720 = vmatpush.msra.mxu2 %v706_v23  ;;  %753 = vmatpush.msra.mxu3 %v739_v24  ;;  %v1266_v55 = vmax.f32 %v397_v47, 0.0  ;;  %v866_v23 = vld [vmem:[#allocation2 + $0x388] sm:$0xff] }
  0xa5   : > { %786 = vmatpush.msrb.mxu0 %v772_v25  ;;  %689 = vmatpush.msra.mxu1 %v671_v26  ;;  %v899_v24 = vld [vmem:[#allocation2 + $0x3c8] sm:$0xff]  ;;  %v832_v26 = vld [vmem:[#allocation2 + $0x340] sm:$0xff] }
  0xa6   : > { %721 = vmatpush.msra.mxu2 %v705_v27  ;;  %754 = vmatpush.msra.mxu3 %v738_v28  ;;  %v708_v62 = vrot.slane %v1266_v55, 1  ;;  %v741_v63 = vrot.slane %v1266_v55, 2  ;;  %v774_v1 = vrot.slane %v1266_v55, 3  ;;  %v807_v25 = vrot.slane %v1266_v55, 4  ;;  %v865_v27 = vld [vmem:[#allocation2 + $0x380] sm:$0xff]  ;;  %v932_v47 = vld [vmem:[%s1325_s5 + $0x8] sm:$0xff] }
  0xa7   : > { %787 = vmatpush.msrb.mxu0 %v771_v29  ;;  %1080 = vmatmul.msk.f32.vlgmr.msrb.gmra.mxu1 %vm410_vm2, %v543_v30  ;;  %v898_v28 = vld [vmem:[#allocation2 + $0x3c0] sm:$0xff]  ;;  %v840_v29 = vrot.slane %v1266_v55, 5  ;;  %v873_v30 = vrot.slane %v1266_v55, 6 }
  0xa8   : > { %690 = vmatpush.msra.mxu1 %v670_v31  ;;  %722 = vmatpush.msra.mxu2 %v704_v32  ;;  %v906_v31 = vrot.slane %v1266_v55, 7  ;;  %v401_v32 = vld [vmem:[%s1324_s4] sm:$0x1] }
  0xa9   : > { %755 = vmatpush.msra.mxu3 %v737_v33  ;;  %788 = vmatpush.msrb.mxu0 %v770_v34 }
  0xaa   : > { %1081 = vmatmul.msk.f32.vlgmr.msrb.gmra.mxu2 %vm410_vm2, %v576_v35  ;;  %1082 = vmatmul.msk.f32.vlgmr.msrb.gmra.mxu3 %vm410_vm2, %v609_v36 }
  0xab   : > { %1083 = vmatmul.msk.f32.vlgmr.msra.gmra.mxu0 %vm410_vm2, %v642_v39  ;;  %691 = vmatpush.msra.mxu1 %v669_v37 }
  0xac   : > { %723 = vmatpush.msra.mxu2 %v703_v40  ;;  %756 = vmatpush.msra.mxu3 %v736_v41 }
  0xad   : > { %789 = vmatpush.msrb.mxu0 %v769_v42  ;;  %692 = vmatpush.msra.mxu1 %v668_v43 }
  0xae   : > { %724 = vmatpush.msra.mxu2 %v702_v45  ;;  %757 = vmatpush.msra.mxu3 %v735_v46  ;;  %v933_v46 = vld [vmem:[%s1325_s5 + $0x10] sm:$0xf] }
  0xaf   : > { %790 = vmatpush.msrb.mxu0 %v768_v48  ;;  %693 = vmatpush.msra.mxu1 %v667_v49  ;;  %v931_v49 = vld [vmem:[%s1325_s5] sm:$0xff] }
  0xb0   : > { %725 = vmatpush.msra.mxu2 %v701_v50  ;;  %758 = vmatpush.msra.mxu3 %v734_v51 }
  0xb1   : > { %791 = vmatpush.msrb.mxu0 %v767_v52  ;;  %818 = vmatpush.msrb.mxu1 %v806_v53 }
  0xb2   : > { %1084 = vmatmul.msk.f32.vlgmr.msra.gmra.mxu1 %vm410_vm2, %v1266_v55  ;;  %726 = vmatpush.msra.mxu2 %v700_v54 }
  0xb3   : > { %759 = vmatpush.msra.mxu3 %v733_v56  ;;  %792 = vmatpush.msrb.mxu0 %v766_v57 }
  0xb4   : > { %819 = vmatpush.msrb.mxu1 %v805_v58  ;;  %851 = vmatpush.msrb.mxu2 %v839_v59 }
  0xb5   : > { %884 = vmatpush.msrb.mxu3 %v872_v60  ;;  %917 = vmatpush.msra.mxu0 %v905_v61 }
  0xb6   : > { %1085 = vmatmul.msk.f32.vlgmr.msra.gmra.mxu2 %vm410_vm2, %v708_v62  ;;  %1086 = vmatmul.msk.f32.vlgmr.msra.gmra.mxu3 %vm410_vm2, %v741_v63 }
  0xb7   : > { %1087 = vmatmul.msk.f32.vlgmr.msrb.gmra.mxu0 %vm410_vm2, %v774_v1  ;;  %820 = vmatpush.msrb.mxu1 %v804_v0 }
  0xb8   : > { %852 = vmatpush.msrb.mxu2 %v838_v2  ;;  %885 = vmatpush.msrb.mxu3 %v871_v3 }
  0xb9   : > { %918 = vmatpush.msra.mxu0 %v904_v4  ;;  %821 = vmatpush.msrb.mxu1 %v803_v5  ;;  %v965_v5 = vld [vmem:[%s1327_s7 + $0x10] sm:$0xf] }
  0xba   : > { %853 = vmatpush.msrb.mxu2 %v837_v6  ;;  %886 = vmatpush.msrb.mxu3 %v870_v7  ;;  %v964_v6 = vld [vmem:[%s1327_s7 + $0x8] sm:$0xff]  ;;  %v963_v7 = vld [vmem:[%s1327_s7] sm:$0xff] }
  0xbb   : > { %919 = vmatpush.msra.mxu0 %v903_v8  ;;  %822 = vmatpush.msrb.mxu1 %v802_v9  ;;  %v934_v8 = vld [vmem:[%s1326_s6] sm:$0x1] }
  0xbc   : > { %854 = vmatpush.msrb.mxu2 %v836_v10  ;;  %887 = vmatpush.msrb.mxu3 %v869_v11 }
  0xbd   : > { %920 = vmatpush.msra.mxu0 %v902_v12  ;;  %823 = vmatpush.msrb.mxu1 %v801_v13  ;;  %v966_v12 = vld [vmem:[%s1328_s8] sm:$0x1] }
  0xbe   : > { %855 = vmatpush.msrb.mxu2 %v835_v14  ;;  %888 = vmatpush.msrb.mxu3 %v868_v15 }
  0xbf   : > { %921 = vmatpush.msra.mxu0 %v901_v16  ;;  %824 = vmatpush.msrb.mxu1 %v800_v17 }
  0xc0   : > { %856 = vmatpush.msrb.mxu2 %v834_v18  ;;  %889 = vmatpush.msrb.mxu3 %v867_v19 }
  0xc1   : > { %922 = vmatpush.msra.mxu0 %v900_v20  ;;  %825 = vmatpush.msrb.mxu1 %v799_v21 }
  0xc2   : > { %857 = vmatpush.msrb.mxu2 %v833_v22  ;;  %890 = vmatpush.msrb.mxu3 %v866_v23 }
  0xc3   : > { %923 = vmatpush.msra.mxu0 %v899_v24  ;;  %1088 = vmatmul.msk.f32.vlgmr.msrb.gmra.mxu1 %vm410_vm2, %v807_v25 }
  0xc4   : > { %858 = vmatpush.msrb.mxu2 %v832_v26  ;;  %891 = vmatpush.msrb.mxu3 %v865_v27 }
  0xc5   : > { %924 = vmatpush.msra.mxu0 %v898_v28  ;;  %1089 = vmatmul.msk.f32.vlgmr.msrb.gmra.mxu2 %vm410_vm2, %v840_v29 }
  0xc6   : > { %1090 = vmatmul.msk.f32.vlgmr.msrb.gmra.mxu3 %vm410_vm2, %v873_v30  ;;  %1091 = vmatmul.msk.f32.vlgmr.msra.gmra.mxu0 %vm410_vm2, %v906_v31 }
  0xc7   : > { %1092 = vmatpush.msk.msra.mxu1 %vm372_vm0, %v933_v46  ;;  %1094 = vmatpush.msk.msra.mxu2 %vm372_vm0, %v965_v5 }
  0xc9   : > { %956 = vmatpush.msra.mxu1 %v932_v47  ;;  %987 = vmatpush.msra.mxu2 %v964_v6 }
  0xcb   : > { %957 = vmatpush.msra.mxu1 %v931_v49  ;;  %988 = vmatpush.msra.mxu2 %v963_v7 }
 0x11b   : > { %v431_v33 = vpop.f32.mrf.mxu1 }
 0x11c   : > { %v434_v34 = vadd.f32 %v431_v33, %v401_v32 }
 0x11e   : > { %v530_v39 = vpop.f32.mrf.mxu0 }
 0x123   : > { %v464_v35 = vpop.f32.mrf.mxu2  ;;  %v497_v37 = vpop.f32.mrf.mxu3 }
 0x124   : > { %v467_v36 = vadd.f32 %v464_v35, %v434_v34  ;;  %v563_v41 = vpop.f32.mrf.mxu1 }
 0x126   : > { %v500_v38 = vadd.f32 %v497_v37, %v467_v36 }
 0x128   : > { %v533_v40 = vadd.f32 %v530_v39, %v500_v38  ;;  %v662_v50 = vpop.f32.mrf.mxu0 }
 0x12a   : > { %v566_v42 = vadd.f32 %v563_v41, %v533_v40 }
 0x12d   : > { %v596_v43 = vpop.f32.mrf.mxu2  ;;  %v629_v45 = vpop.f32.mrf.mxu3 }
 0x12e   : > { %v599_v44 = vadd.f32 %v596_v43, %v566_v42 }
 0x12f   : > { %v695_v52 = vpop.f32.mrf.mxu1 }
 0x130   : > { %v632_v48 = vadd.f32 %v629_v45, %v599_v44 }
 0x132   : > { %v665_v51 = vadd.f32 %v662_v50, %v632_v48 }
 0x134   : > { %v698_v53 = vadd.f32 %v695_v52, %v665_v51  ;;  %v794_v58 = vpop.f32.mrf.mxu0 }
 0x139   : > { %v728_v54 = vpop.f32.mrf.mxu2  ;;  %v761_v56 = vpop.f32.mrf.mxu3 }
 0x13a   : > { %v731_v55 = vadd.f32 %v728_v54, %v698_v53 }
 0x13c   : > { %v764_v57 = vadd.f32 %v761_v56, %v731_v55 }
 0x13e   : > { %v797_v59 = vadd.f32 %v794_v58, %v764_v57 }
 0x140   : > { %v827_v60 = vpop.f32.mrf.mxu1 }
 0x141   : > { %v830_v61 = vadd.f32 %v827_v60, %v797_v59 }
 0x143   : > { %v926_v2 = vpop.f32.mrf.mxu0 }
 0x148   : > { %v860_v62 = vpop.f32.mrf.mxu2 }
 0x149   : > { %v863_v63 = vadd.f32 %v860_v62, %v830_v61  ;;  %v893_v0 = vpop.f32.mrf.mxu3 }
 0x14b   : > { %v896_v1 = vadd.f32 %v893_v0, %v863_v63 }
 0x14d   : > { %v929_v3 = vadd.f32 %v926_v2, %v896_v1 }
 0x14f   : > { %1122 = vtanh.f32 %v929_v3 }
 0x155   : > { %v1123_v4 = vpop.eup %1122 }
 0x156   : > { %1093 = vmatmul.msk.f32.vlgmr.msra.gmra.mxu1 %vm935_vm3, %v1123_v4 }
 0x1d3   : > { %v959_v9 = vpop.f32.mrf.mxu1 }
 0x1d4   : > { %v960_v10 = vadd.f32 %v959_v9, %v934_v8 }
 0x1d6   : > { %1124 = vtanh.f32 %v960_v10 }
 0x1dc   : > { %v1125_v11 = vpop.eup %1124 }
 0x1dd   : > { %1095 = vmatmul.msk.f32.vlgmr.msra.gmra.mxu2 %vm935_vm3, %v1125_v11 }
 0x260   : > { %v990_v13 = vpop.f32.mrf.mxu2 }
 0x261   : > { %v991_v14 = vadd.f32 %v990_v13, %v966_v12 }
 0x263   : > { %v994_v15 = vsel %vm993_vm4, %v991_v14, -inf }
 0x264   : > { %995 = vmax.xlane.f32.xlu1 %v994_v15 }
 0x2d7   : > { %v996_v16 = vpop.xlane.xlu1 %995 }
 0x2d8   : > { %v997_v17 = vsub.f32 %v991_v14, %v996_v16 }
 0x2da   : > { %v998_v18 = vmul.f32 1.442695, %v997_v17 }
 0x2dc   : > { %1126 = vpow2.f32 %v998_v18 }
 0x2e2   : > { %v1127_v19 = vpop.eup %1126 }
 0x2e3   : > { %v1000_v20 = vsel %vm993_vm4, %v1127_v19, 0.0 }
 0x2e4   : > { %1001 = vadd.xlane.f32.xlu1 %v1000_v20 }
 0x357   : > { %v1002_v21 = vpop.xlane.xlu1 %1001 }
 0x358   : > { %1128 = vrcp.f32 %v1002_v21 }
 0x35e   : > { %v1129_v22 = vpop.eup %1128 }
 0x35f   : > { %v1004_v23 = vmul.f32 %v1129_v22, %v1127_v19 }
 0x361   : > { %1005 = vst [vmem:[%s345_s11] sm:$0x1] %v1004_v23 }
 0x362 PF: > { %s20_s30 = sadd.s32 1, %s1170_s30  }
 0x363   : > { %p17_p7 = scmp.ge.s32.totalorder %s20_s30, 4  }
 0x365   :  { %19 = sbr.rel (!%p17_p7) target bundleno = 1 (0x1), region = 106 }
 0x36a   :  { %1023 = vsyncpa [#allocation3], 1 }
 0x36b   :  { %1025 = vsyncpa [#allocation3 + $0x1], 1 }

</bundles_post_ra>
